<compile_context>
chip_gen: v5e
topology: v5e:2x2
jax: 0.10.0
libtpu: 0.0.40
codegen_flags: <defaults>
</compile_context>

<pallas_src>
import jax
import jax.numpy as jnp
from jax.experimental import pallas as pl
from jax.experimental.pallas import tpu as pltpu

# Module constants (constant-folded into the kernels via the separable form:
#   SOBEL_X = [1,2,1]^T (rows) x [-1,0,1] (cols),  SOBEL_Y = [-1,0,1]^T x [1,2,1]).
SOBEL_KERNEL_X = ((-1.0, 0.0, 1.0), (-2.0, 0.0, 2.0), (-1.0, 0.0, 1.0))
SOBEL_KERNEL_Y = ((-1.0, -2.0, -1.0), (0.0, 0.0, 0.0), (1.0, 2.0, 1.0))

_VMEM_LIMIT = 48 * 1024 * 1024       # scoped VMEM limit for all calls (safe on v5e/v6e/v7x)
_FUSED_MAX_ELEMS = 1 << 20           # fused single-pass path for planes up to 1024x1024 f32
_TILE_ELEM_BUDGET = 768 * 1024       # per-tile element budget (~12 live planes < 48 MiB)


def _round_up(a, b):
    return -(-a // b) * b


def _sobel_msq(xc, x_above, x_below):
    """Squared Sobel gradient magnitude (ex^2 + ey^2) for an (R, W) row block.

    xc      : (R, W) rows of the (padded) image
    x_above : (1, W) row directly above xc (zeros at the image top)
    x_below : (1, W) row directly below xc (zeros at the image bottom)

    Left/right 1-pixel zero padding is handled with pltpu.roll (XLU slot) plus
    a precomputed (1, W) 0/1 multiplicand; boundary masks are built once and
    reused (JAX does not CSE broadcast_in_dim).
    """
    r, w = xc.shape
    col = jax.lax.broadcasted_iota(jnp.int32, (1, w), 1)
    not_first_col = (col > 0).astype(xc.dtype)       # zeroes wrapped col j-1 at j == 0
    not_last_col = (col < w - 1).astype(xc.dtype)    # zeroes wrapped col j+1 at j == w-1

    def col_pass(v):
        left = pltpu.roll(v, 1, axis=1) * not_first_col        # v[:, j-1]
        right = pltpu.roll(v, w - 1, axis=1) * not_last_col    # v[:, j+1]
        return right - left, left + 2.0 * v + right            # (gx, sx)

    gx_c, sx_c = col_pass(xc)
    gx_a, sx_a = col_pass(x_above)
    gx_b, sx_b = col_pass(x_below)

    # Row (sublane) pass: shift by +/-1 row (XLU roll), splicing boundary rows.
    row = jax.lax.broadcasted_iota(jnp.int32, (r, 1), 0)
    is_first_row = row == 0
    is_last_row = row == r - 1
    gx_up = jnp.where(is_first_row, gx_a, pltpu.roll(gx_c, 1, axis=0))        # gx(r-1)
    sx_up = jnp.where(is_first_row, sx_a, pltpu.roll(sx_c, 1, axis=0))        # sx(r-1)
    gx_dn = jnp.where(is_last_row, gx_b, pltpu.roll(gx_c, r - 1, axis=0))     # gx(r+1)
    sx_dn = jnp.where(is_last_row, sx_b, pltpu.roll(sx_c, r - 1, axis=0))     # sx(r+1)

    ex = gx_up + 2.0 * gx_c + gx_dn     # conv with SOBEL_KERNEL_X
    ey = sx_dn - sx_up                  # conv with SOBEL_KERNEL_Y
    return ex * ex + ey * ey


def _halo_rows(xa_ref, xb_ref):
    """Row just above / below the current tile, zeroed at the image top/bottom."""
    i = pl.program_id(0)
    n = pl.num_programs(0)
    halo = xa_ref.shape[0]
    xa = xa_ref[pl.ds(halo - 1, 1), :] * jnp.where(i == 0, 0.0, 1.0)
    xb = xb_ref[pl.ds(0, 1), :] * jnp.where(i == n - 1, 0.0, 1.0)
    return xa, xb


def _make_max_kernel(tm, h_valid, w_valid, hp, wp):
    """Pass 1: per-tile max of the squared magnitude ('parallel' -> both TCs on v7x)."""
    need_row = hp > h_valid
    need_col = wp > w_valid

    def kernel(xc_ref, xa_ref, xb_ref, tmax_ref):
        xa, xb = _halo_rows(xa_ref, xb_ref)
        msq = _sobel_msq(xc_ref[...], xa, xb)
        if need_row or need_col:                         # exclude zero-padded region
            valid = None
            if need_row:
                row = (jax.lax.broadcasted_iota(jnp.int32, msq.shape, 0)
                       + pl.program_id(0) * tm)
                valid = row < h_valid
            if need_col:
                col = jax.lax.broadcasted_iota(jnp.int32, msq.shape, 1)
                cval = col < w_valid
                valid = cval if valid is None else (valid & cval)
            msq = jnp.where(valid, msq, 0.0)
        tmax_ref[0] = jnp.max(msq)

    return kernel


def _make_threshold_kernel(low, high):
    """Pass 2: recompute msq, normalize with precomputed 1/max(msq), one sqrt, threshold."""

    def kernel(inv_ref, xc_ref, xa_ref, xb_ref, out_ref):
        xa, xb = _halo_rows(xa_ref, xb_ref)
        msq = _sobel_msq(xc_ref[...], xa, xb)
        e = jnp.sqrt(msq * inv_ref[0])        # = edge / edge.max()
        e = jnp.where(e >= high, 1.0, e)
        e = jnp.where(e <= low, 0.0, e)
        out_ref[...] = e

    return kernel


def _make_fused_kernel(low, high, h_valid, w_valid, hp, wp):
    """Whole-plane-in-VMEM path: read once, msq + max + normalize + threshold, write once."""
    need_mask = hp > h_valid or wp > w_valid

    def kernel(x_ref, out_ref):
        zero_row = jnp.zeros((1, wp), jnp.float32)
        msq = _sobel_msq(x_ref[...], zero_row, zero_row)
        msq_valid = msq
        if need_mask:                                   # exclude zero-padded region from max
            row = jax.lax.broadcasted_iota(jnp.int32, (hp, wp), 0)
            col = jax.lax.broadcasted_iota(jnp.int32, (hp, wp), 1)
            msq_valid = jnp.where((row < h_valid) & (col < w_valid), msq, 0.0)
        inv = 1.0 / jnp.max(msq_valid)                  # flat image -> inf -> NaN (matches torch)
        e = jnp.sqrt(msq * inv)
        e = jnp.where(e >= high, 1.0, e)
        e = jnp.where(e <= low, 0.0, e)
        out_ref[...] = e

    return kernel


def sobel_operator(image_tensor, low_threshold, high_threshold,
                   tile_rows=None, force_tiled=False):
    """image_tensor: (1, 1, H, W) float32 in [0, 1] (NCHW). Returns (1, 1, H, W) float32."""
    assert image_tensor.ndim == 4 and image_tensor.shape[:2] == (1, 1)
    x = image_tensor[0, 0].astype(jnp.float32)          # (H, W) grayscale plane
    H, W = x.shape
    low = float(low_threshold)
    high = float(high_threshold)

    # Pad to lane-dense width (multiple of 128 -> unmasked vst) and 8-aligned rows.
    # Extra zero rows/cols reproduce conv2d's implicit zero padding on the valid
    # region; they are excluded from the max and sliced off the output.
    Wp = _round_up(W, 128)
    Hp8 = _round_up(H, 8)

    # --- Fused single-pass path (small/medium planes that fit VMEM comfortably) ---
    use_fused = (not force_tiled) and tile_rows is None and Hp8 * Wp <= _FUSED_MAX_ELEMS
    if use_fused:
        Hp = Hp8
        xp = x if (Hp == H and Wp == W) else jnp.pad(x, ((0, Hp - H), (0, Wp - W)))
        edge = pl.pallas_call(
            _make_fused_kernel(low, high, H, W, Hp, Wp),
            out_shape=jax.ShapeDtypeStruct((Hp, Wp), jnp.float32),
            grid=(1,),
            in_specs=[pl.BlockSpec((Hp, Wp), lambda i: (0, 0))],
            out_specs=pl.BlockSpec((Hp, Wp), lambda i: (0, 0)),
            compiler_params=pltpu.CompilerParams(vmem_limit_bytes=_VMEM_LIMIT),
        )(xp)
        return edge[:H, :W][None, None]

    # --- Tiled two-pass path ---
    # Row-tile size: near-even split of the padded height, as large as VMEM allows
    # (cap 512 rows, reduced for very wide images), always a multiple of 8.
    cap = max(8, min(512, (_TILE_ELEM_BUDGET // Wp) // 8 * 8))
    if tile_rows is not None:
        tm = max(8, _round_up(int(tile_rows), 8))
    elif Hp8 <= cap:
        tm = Hp8
    else:
        n_guess = -(-Hp8 // cap)
        tm = _round_up(-(-Hp8 // n_guess), 8)
    n_tiles = -(-Hp8 // tm)
    Hp = n_tiles * tm
    xp = x if (Hp == H and Wp == W) else jnp.pad(x, ((0, Hp - H), (0, Wp - W)))

    rb = tm // 8                       # 8-row halo blocks per tile
    nrb = Hp // 8                      # total 8-row blocks
    center_spec = pl.BlockSpec((tm, Wp), lambda i: (i, 0))
    # Strip whose LAST row is the row just above the tile (clamped + masked at the top).
    above_spec = pl.BlockSpec((8, Wp), lambda i: (jnp.maximum(i * rb - 1, 0), 0))
    # Strip whose FIRST row is the row just below the tile (clamped + masked at the bottom).
    below_spec = pl.BlockSpec((8, Wp), lambda i: (jnp.minimum(i * rb + rb, nrb - 1), 0))
    cparams = pltpu.CompilerParams(dimension_semantics=("parallel",),
                                   vmem_limit_bytes=_VMEM_LIMIT)

    # Pass 1: per-tile max of ex^2+ey^2 (sqrt is monotone, so it is skipped here).
    tile_max = pl.pallas_call(
        _make_max_kernel(tm, H, W, Hp, Wp),
        out_shape=jax.ShapeDtypeStruct((n_tiles,), jnp.float32),
        grid=(n_tiles,),
        in_specs=[center_spec, above_spec, below_spec],
        out_specs=pl.BlockSpec((1,), lambda i: (i,), memory_space=pltpu.SMEM),
        compiler_params=cparams,
    )(xp, xp, xp)
    # One scalar reciprocal outside the kernels. Flat image -> 1/0 = inf -> NaN
    # downstream, matching the PyTorch module's edge.div_(edge.max()) behavior.
    inv_max = (1.0 / jnp.max(tile_max)).reshape(1)

    # Pass 2: recompute per tile (cheaper than an extra edge round-trip to HBM),
    # normalize with the precomputed reciprocal, threshold, write once.
    edge = pl.pallas_call(
        _make_threshold_kernel(low, high),
        out_shape=jax.ShapeDtypeStruct((Hp, Wp), jnp.float32),
        grid=(n_tiles,),
        in_specs=[
            pl.BlockSpec((1,), lambda i: (0,), memory_space=pltpu.SMEM),  # 1 / max(msq)
            center_spec, above_spec, below_spec,
        ],
        out_specs=center_spec,
        compiler_params=cparams,
    )(inv_max, xp, xp, xp)

    return edge[:H, :W][None, None]


def _reference(image_tensor, low, high):
    """Pure-JAX reference mirroring the PyTorch forward (for validation)."""
    x = image_tensor[0, 0].astype(jnp.float32)
    H, W = x.shape
    xp = jnp.pad(x, ((1, 1), (1, 1)))
    ex = jnp.zeros((H, W), jnp.float32)
    ey = jnp.zeros((H, W), jnp.float32)
    for dy in range(3):
        for dx in range(3):
            win = xp[dy:dy + H, dx:dx + W]
            ex = ex + SOBEL_KERNEL_X[dy][dx] * win
            ey = ey + SOBEL_KERNEL_Y[dy][dx] * win
    edge = jnp.sqrt(ex * ex + ey * ey)
    edge = edge / jnp.max(edge)
    edge = jnp.where(edge >= high, 1.0, edge)
    edge = jnp.where(edge <= low, 0.0, edge)
    return edge[None, None]


if __name__ == "__main__":
    key = jax.random.PRNGKey(0)
    low_threshold, high_threshold = 0.1, 0.6

    # (a) small aligned image: exercises the fused whole-plane-in-VMEM path.
    img_a = jax.random.uniform(key, (1, 1, 16, 16), dtype=jnp.float32)
    ref_a = _reference(img_a, low_threshold, high_threshold)
    out_a_fused = jax.block_until_ready(
        sobel_operator(img_a, low_threshold, high_threshold))
    # Same image via the tiled two-pass path (2 row tiles of 8): exercises halo
    # splicing, the parallel per-tile max, and the SMEM inv-max plumbing.
    out_a_tiled = jax.block_until_ready(
        sobel_operator(img_a, low_threshold, high_threshold,
                       tile_rows=8, force_tiled=True))

    # (b) unaligned H/W (13 x 20 -> padded 16 x 128): exercises width/height padding
    # and the valid-region masking of the max in both paths.
    img_b = jax.random.uniform(jax.random.fold_in(key, 1), (1, 1, 13, 20),
                               dtype=jnp.float32)
    ref_b = _reference(img_b, low_threshold, high_threshold)
    out_b_fused = jax.block_until_ready(
        sobel_operator(img_b, low_threshold, high_threshold))
    out_b_tiled = jax.block_until_ready(
        sobel_operator(img_b, low_threshold, high_threshold,
                       tile_rows=8, force_tiled=True))

    assert out_a_fused.shape == (1, 1, 16, 16) and out_a_fused.dtype == jnp.float32
    assert jnp.allclose(out_a_fused, ref_a, atol=1e-5, rtol=1e-5)
    assert jnp.allclose(out_a_tiled, ref_a, atol=1e-5, rtol=1e-5)
    assert out_b_fused.shape == (1, 1, 13, 20) and out_b_fused.dtype == jnp.float32
    assert jnp.allclose(out_b_fused, ref_b, atol=1e-5, rtol=1e-5)
    assert jnp.allclose(out_b_tiled, ref_b, atol=1e-5, rtol=1e-5)

    print("KERNEL_OK")
</pallas_src>

<mosaic_0001>
module attributes {stable_mosaic.version = 11 : i64} {
  func.func @kernel(%arg0: i32, %arg1: memref<16x128xf32, #tpu.memory_space<vmem>>, %arg2: memref<16x128xf32, #tpu.memory_space<vmem>>) attributes {dimension_semantics = [#tpu.dimension_semantics<arbitrary>], iteration_bounds = array<i64: 1>, scalar_prefetch = 0 : i64, scratch_operands = 0 : i64, tpu.core_type = #tpu.core_type<tc>, window_params = [{pipeline_mode = #tpu.pipeline_mode<synchronous>, transform_indices = @transform_0, window_bounds = array<i64: 16, 128>}, {pipeline_mode = #tpu.pipeline_mode<synchronous>, transform_indices = @transform_1, window_bounds = array<i64: 16, 128>}]} {
    %cst = arith.constant 0.000000e+00 : f32
    %0 = vector.broadcast %cst : f32 to vector<1x128xf32>
    %c0 = arith.constant 0 : index
    %c0_0 = arith.constant 0 : index
    %1 = vector.load %arg1[%c0, %c0_0] : memref<16x128xf32, #tpu.memory_space<vmem>>, vector<16x128xf32>
    %2 = tpu.iota {dimensions = array<i32: 1>} : vector<1x128xi32>
    %c0_i32 = arith.constant 0 : i32
    %3 = vector.broadcast %c0_i32 : i32 to vector<1x128xi32>
    %4 = arith.cmpi sgt, %2, %3 : vector<1x128xi32>
    %5 = arith.extui %4 : vector<1x128xi1> to vector<1x128xi32>
    %6 = arith.sitofp %5 : vector<1x128xi32> to vector<1x128xf32>
    %c127_i32 = arith.constant 127 : i32
    %7 = vector.broadcast %c127_i32 : i32 to vector<1x128xi32>
    %8 = arith.cmpi slt, %2, %7 : vector<1x128xi32>
    %9 = arith.extui %8 : vector<1x128xi1> to vector<1x128xi32>
    %10 = arith.sitofp %9 : vector<1x128xi32> to vector<1x128xf32>
    %c1_i32 = arith.constant 1 : i32
    %11 = tpu.dynamic_rotate %1 by %c1_i32 dim 1 : vector<16x128xf32>, i32 -> vector<16x128xf32>
    %12 = vector.broadcast %6 : vector<1x128xf32> to vector<16x128xf32>
    %13 = arith.mulf %11, %12 : vector<16x128xf32>
    %c127_i32_1 = arith.constant 127 : i32
    %14 = tpu.dynamic_rotate %1 by %c127_i32_1 dim 1 : vector<16x128xf32>, i32 -> vector<16x128xf32>
    %15 = vector.broadcast %10 : vector<1x128xf32> to vector<16x128xf32>
    %16 = arith.mulf %14, %15 : vector<16x128xf32>
    %17 = arith.subf %16, %13 : vector<16x128xf32>
    %cst_2 = arith.constant 2.000000e+00 : f32
    %18 = vector.broadcast %cst_2 : f32 to vector<16x128xf32>
    %19 = arith.mulf %18, %1 : vector<16x128xf32>
    %20 = arith.addf %13, %19 : vector<16x128xf32>
    %21 = arith.addf %20, %16 : vector<16x128xf32>
    %c1_i32_3 = arith.constant 1 : i32
    %22 = tpu.dynamic_rotate %0 by %c1_i32_3 dim 1 : vector<1x128xf32>, i32 -> vector<1x128xf32>
    %23 = arith.mulf %22, %6 : vector<1x128xf32>
    %c127_i32_4 = arith.constant 127 : i32
    %24 = tpu.dynamic_rotate %0 by %c127_i32_4 dim 1 : vector<1x128xf32>, i32 -> vector<1x128xf32>
    %25 = arith.mulf %24, %10 : vector<1x128xf32>
    %26 = arith.subf %25, %23 : vector<1x128xf32>
    %cst_5 = arith.constant 2.000000e+00 : f32
    %27 = vector.broadcast %cst_5 : f32 to vector<1x128xf32>
    %28 = arith.mulf %27, %0 : vector<1x128xf32>
    %29 = arith.addf %23, %28 : vector<1x128xf32>
    %30 = arith.addf %29, %25 : vector<1x128xf32>
    %c1_i32_6 = arith.constant 1 : i32
    %31 = tpu.dynamic_rotate %0 by %c1_i32_6 dim 1 : vector<1x128xf32>, i32 -> vector<1x128xf32>
    %32 = arith.mulf %31, %6 : vector<1x128xf32>
    %c127_i32_7 = arith.constant 127 : i32
    %33 = tpu.dynamic_rotate %0 by %c127_i32_7 dim 1 : vector<1x128xf32>, i32 -> vector<1x128xf32>
    %34 = arith.mulf %33, %10 : vector<1x128xf32>
    %35 = arith.subf %34, %32 : vector<1x128xf32>
    %cst_8 = arith.constant 2.000000e+00 : f32
    %36 = vector.broadcast %cst_8 : f32 to vector<1x128xf32>
    %37 = arith.mulf %36, %0 : vector<1x128xf32>
    %38 = arith.addf %32, %37 : vector<1x128xf32>
    %39 = arith.addf %38, %34 : vector<1x128xf32>
    %40 = tpu.iota {dimensions = array<i32: 0>} : vector<16x1xi32>
    %c0_i32_9 = arith.constant 0 : i32
    %41 = vector.broadcast %c0_i32_9 : i32 to vector<16x1xi32>
    %42 = arith.cmpi eq, %40, %41 : vector<16x1xi32>
    %c15_i32 = arith.constant 15 : i32
    %43 = vector.broadcast %c15_i32 : i32 to vector<16x1xi32>
    %44 = arith.cmpi eq, %40, %43 : vector<16x1xi32>
    %c1_i32_10 = arith.constant 1 : i32
    %45 = tpu.dynamic_rotate %17 by %c1_i32_10 dim 0 : vector<16x128xf32>, i32 -> vector<16x128xf32>
    %46 = vector.shape_cast %42 : vector<16x1xi1> to vector<16x1xi1>
    %47 = vector.broadcast %46 : vector<16x1xi1> to vector<16x128xi1>
    %48 = vector.shape_cast %26 : vector<1x128xf32> to vector<1x128xf32>
    %49 = vector.broadcast %48 : vector<1x128xf32> to vector<16x128xf32>
    %50 = arith.select %47, %49, %45 : vector<16x128xi1>, vector<16x128xf32>
    %c1_i32_11 = arith.constant 1 : i32
    %51 = tpu.dynamic_rotate %21 by %c1_i32_11 dim 0 : vector<16x128xf32>, i32 -> vector<16x128xf32>
    %52 = vector.shape_cast %42 : vector<16x1xi1> to vector<16x1xi1>
    %53 = vector.broadcast %52 : vector<16x1xi1> to vector<16x128xi1>
    %54 = vector.shape_cast %30 : vector<1x128xf32> to vector<1x128xf32>
    %55 = vector.broadcast %54 : vector<1x128xf32> to vector<16x128xf32>
    %56 = arith.select %53, %55, %51 : vector<16x128xi1>, vector<16x128xf32>
    %c15_i32_12 = arith.constant 15 : i32
    %57 = tpu.dynamic_rotate %17 by %c15_i32_12 dim 0 : vector<16x128xf32>, i32 -> vector<16x128xf32>
    %58 = vector.shape_cast %44 : vector<16x1xi1> to vector<16x1xi1>
    %59 = vector.broadcast %58 : vector<16x1xi1> to vector<16x128xi1>
    %60 = vector.shape_cast %35 : vector<1x128xf32> to vector<1x128xf32>
    %61 = vector.broadcast %60 : vector<1x128xf32> to vector<16x128xf32>
    %62 = arith.select %59, %61, %57 : vector<16x128xi1>, vector<16x128xf32>
    %c15_i32_13 = arith.constant 15 : i32
    %63 = tpu.dynamic_rotate %21 by %c15_i32_13 dim 0 : vector<16x128xf32>, i32 -> vector<16x128xf32>
    %64 = vector.shape_cast %44 : vector<16x1xi1> to vector<16x1xi1>
    %65 = vector.broadcast %64 : vector<16x1xi1> to vector<16x128xi1>
    %66 = vector.shape_cast %39 : vector<1x128xf32> to vector<1x128xf32>
    %67 = vector.broadcast %66 : vector<1x128xf32> to vector<16x128xf32>
    %68 = arith.select %65, %67, %63 : vector<16x128xi1>, vector<16x128xf32>
    %cst_14 = arith.constant 2.000000e+00 : f32
    %69 = vector.broadcast %cst_14 : f32 to vector<16x128xf32>
    %70 = arith.mulf %69, %17 : vector<16x128xf32>
    %71 = arith.addf %50, %70 : vector<16x128xf32>
    %72 = arith.addf %71, %62 : vector<16x128xf32>
    %73 = arith.subf %68, %56 : vector<16x128xf32>
    %74 = arith.mulf %72, %72 : vector<16x128xf32>
    %75 = arith.mulf %73, %73 : vector<16x128xf32>
    %76 = arith.addf %74, %75 : vector<16x128xf32>
    %77 = tpu.iota {dimensions = array<i32: 0>} : vector<16x128xi32>
    %78 = tpu.iota {dimensions = array<i32: 1>} : vector<16x128xi32>
    %c16_i32 = arith.constant 16 : i32
    %79 = vector.broadcast %c16_i32 : i32 to vector<16x128xi32>
    %80 = arith.cmpi slt, %77, %79 : vector<16x128xi32>
    %c16_i32_15 = arith.constant 16 : i32
    %81 = vector.broadcast %c16_i32_15 : i32 to vector<16x128xi32>
    %82 = arith.cmpi slt, %78, %81 : vector<16x128xi32>
    %83 = arith.andi %80, %82 : vector<16x128xi1>
    %cst_16 = arith.constant 0.000000e+00 : f32
    %84 = vector.broadcast %cst_16 : f32 to vector<16x128xf32>
    %85 = arith.select %83, %76, %84 : vector<16x128xi1>, vector<16x128xf32>
    %86 = vector.shape_cast %85 : vector<16x128xf32> to vector<1x16x128xf32>
    %cst_17 = arith.constant dense<0xFF800000> : vector<1xf32>
    %87 = vector.multi_reduction <maximumf>, %86, %cst_17 [1, 2] : vector<1x16x128xf32> to vector<1xf32>
    %88 = vector.shape_cast %87 : vector<1xf32> to vector<1x1x1xf32>
    %89 = vector.extract %88[0, 0, 0] : f32 from vector<1x1x1xf32>
    %cst_18 = arith.constant 1.000000e+00 : f32
    %90 = arith.divf %cst_18, %89 : f32
    %91 = vector.broadcast %90 : f32 to vector<16x128xf32>
    %92 = arith.mulf %76, %91 : vector<16x128xf32>
    %93 = math.sqrt %92 : vector<16x128xf32>
    %cst_19 = arith.constant 6.000000e-01 : f32
    %94 = vector.broadcast %cst_19 : f32 to vector<16x128xf32>
    %95 = arith.cmpf oge, %93, %94 : vector<16x128xf32>
    %cst_20 = arith.constant 1.000000e+00 : f32
    %96 = vector.broadcast %cst_20 : f32 to vector<16x128xf32>
    %97 = arith.select %95, %96, %93 : vector<16x128xi1>, vector<16x128xf32>
    %cst_21 = arith.constant 1.000000e-01 : f32
    %98 = vector.broadcast %cst_21 : f32 to vector<16x128xf32>
    %99 = arith.cmpf ole, %97, %98 : vector<16x128xf32>
    %cst_22 = arith.constant 0.000000e+00 : f32
    %100 = vector.broadcast %cst_22 : f32 to vector<16x128xf32>
    %101 = arith.select %99, %100, %97 : vector<16x128xi1>, vector<16x128xf32>
    %c0_23 = arith.constant 0 : index
    %c0_24 = arith.constant 0 : index
    %102 = vector.load %arg2[%c0_23, %c0_24] : memref<16x128xf32, #tpu.memory_space<vmem>>, vector<16x128xf32>
    tpu.vector_store %arg2[%c0_23, %c0_24], %101 {strides = array<i32>} : memref<16x128xf32, #tpu.memory_space<vmem>>, vector<16x128xf32>,
    return
  }
  func.func @transform_0(%arg0: i32) -> (i32, i32) {
    %c0_i32 = arith.constant 0 : i32
    %c0_i32_0 = arith.constant 0 : i32
    %c0_i32_1 = arith.constant 0 : i32
    return %c0_i32, %c0_i32_0 : i32, i32
  }
  func.func @transform_1(%arg0: i32) -> (i32, i32) {
    %c0_i32 = arith.constant 0 : i32
    %c0_i32_0 = arith.constant 0 : i32
    %c0_i32_1 = arith.constant 0 : i32
    return %c0_i32, %c0_i32_0 : i32, i32
  }
}

</mosaic_0001>

<bundles_post_ra>
// kernel: tpu_custom_call.1
= control target key start
LH: loop header
LB: loop body
LE: loop exit
PB: predicated region body
PF: predicated region fallthrough
CT: control target
= control target key end

     0   :  { %6 = vsyncpa [#allocation3], 0  ;;  %s327_s0 = inlined_call_operand.hbm [shape: f32[16,128], index: 0, kind: input, shape index: {}]   ;;  %s328_s1 = inlined_call_operand.hbm [shape: f32[16,128], index: 1, kind: output, shape index: {}]  }
   0x1   :  { %7 = vsyncpa [#allocation4], 0  ;;  %s12_s8 = sshll.u32 %s327_s0, 4  ;;  %s281_s9 = smov [#allocation2]   ;;  %s13_s8 = int_to_ptr.hbm [resolvable:$true] %s12_s8 }
   0x2   :  { %s14_s10 = sshll.u32 %s281_s9, 4  ;;  %s282_s11 = smov 128   ;;  %s15_s10 = int_to_ptr.vmem [resolvable:$true] %s14_s10 }
   0x3   :  { %s283_s12 = smov 8  }
   0x4   :  { %20 = dma.hbm_to_vmem [thread:$0]  %s13_s8, 256, %s15_s10, [#allocation3], %s282_s11, %s282_s11, %s283_s12  }
   0x5   :  { %277 = dma.done.wait [#allocation3], 256  }
   0x6   :  { %278 = vsyncadd [#allocation3], 4294967040  ;;  %v284_v0 = vmov 0.0   ;;  %s285_s13 = smov 1   ;;  %v25_v1 = vld [vmem:[#allocation2] sm:$0xff]  ;;  %s286_s14 = smov 127   ;;  %v27_v3 = vlaneseq }
   0x7   :  { %55 = vrot.lane.b32.xlu2 %v284_v0, %s285_s13  ;;  %41 = vrot.lane.b32.xlu1 %v25_v1, %s286_s14  ;;  %v26_v2 = vld [vmem:[#allocation2 + $0x8] sm:$0xff]  ;;  %v49_v7 = vmul.f32 2.0, %v25_v1  ;;  %s287_s16 = smov [#allocation5]   ;;  %s197_s20 = sshll.u32 %s328_s1, 4  ;;  %s198_s20 = int_to_ptr.hbm [resolvable:$true] %s197_s20 }
   0x8   :  { %35 = vrot.lane.b32.xlu0 %v25_v1, %s285_s13  ;;  %v304_v5 = vand.u32 127, %v27_v3  ;;  %v65_v18 = vshrl.u32 %v27_v3, 7  ;;  %v50_v19 = vmul.f32 2.0, %v26_v2  ;;  %s195_s17 = sshll.u32 %s287_s16, 4  ;;  %s196_s17 = int_to_ptr.vmem [resolvable:$true] %s195_s17 }
   0xa   :  { %vm29_vm0 = vcmp.gt.s32.totalorder %v304_v5, 0  ;;  %vm32_vm1 = vcmp.lt.s32.totalorder %v304_v5, 127  ;;  %v66_v27 = vadd.s32 8, %v65_v18  ;;  %vm73_vm2 = vcmp.lt.s32.totalorder %v65_v18, 1 }
   0xb   :  { %v210_v6 = vsel %vm29_vm0, 1.0, %v284_v0  ;;  %v211_v9 = vsel %vm32_vm1, 1.0, %v284_v0  ;;  %vm67_vm3 = vcmp.eq.s32.totalorder %v65_v18, 0  ;;  %vm92_vm4 = vcmp.lt.s32.totalorder %v65_v18, 7 }
   0xc   :  { %vm70_vm5 = vcmp.eq.s32.totalorder %v66_v27, 15  ;;  %vm123_vm6 = vcmp.lt.s32.totalorder %v304_v5, 16 }
   0xf   :  { %58 = vrot.lane.b32.xlu2 %v284_v0, %s286_s14  ;;  %43 = vrot.lane.b32.xlu1 %v26_v2, %s286_s14 }
  0x10   :  { %37 = vrot.lane.b32.xlu0 %v26_v2, %s285_s13 }
  0x61   :  { %v56_v4 = vpop.permute.xlu2 %55 }
  0x62   :  { %v57_v13 = vmul.f32 %v210_v6, %v56_v4 }
  0x69   :  { %v59_v8 = vpop.permute.xlu2 %58 }
  0x6a   :  { %v60_v16 = vmul.f32 %v211_v9, %v59_v8 }
  0x6c   :  { %v61_v20 = vsub.f32 %v60_v16, %v57_v13  ;;  %v63_v22 = vadd.f32 %v60_v16, %v57_v13 }
  0x6e   :  { %v80_v28 = vperm.slane %v61_v20, 0  ;;  %v87_v32 = vperm.slane %v63_v22, 0 }
  0x79   :  { %v42_v10 = vpop.permute.xlu1 %41 }
  0x7a   :  { %v36_v11 = vpop.permute.xlu0 %35  ;;  %v45_v14 = vmul.f32 %v211_v9, %v42_v10 }
  0x7b   :  { %v39_v12 = vmul.f32 %v210_v6, %v36_v11 }
  0x7d   :  { %v51_v15 = vadd.f32 %v49_v7, %v39_v12  ;;  %v47_v21 = vsub.f32 %v45_v14, %v39_v12 }
  0x7f   :  { %v53_v17 = vadd.f32 %v51_v15, %v45_v14  ;;  %v71_v31 = vrot.slane %v47_v21, 7  ;;  %v90_v38 = vrot.slane %v47_v21, 1  ;;  %v107_v44 = vmul.f32 2.0, %v47_v21 }
  0x81   :  { %v44_v23 = vpop.permute.xlu1 %43  ;;  %v83_v37 = vrot.slane %v53_v17, 7  ;;  %v101_v39 = vrot.slane %v53_v17, 1 }
  0x82   :  { %v38_v24 = vpop.permute.xlu0 %37  ;;  %v46_v25 = vmul.f32 %v211_v9, %v44_v23 }
  0x83   :  { %v40_v26 = vmul.f32 %v210_v6, %v38_v24 }
  0x85   :  { %v48_v29 = vsub.f32 %v46_v25, %v40_v26  ;;  %v52_v30 = vadd.f32 %v50_v19, %v40_v26 }
  0x87   :  { %v54_v33 = vadd.f32 %v52_v30, %v46_v25  ;;  %v72_v34 = vrot.slane %v48_v29, 7  ;;  %v91_v35 = vrot.slane %v48_v29, 1  ;;  %v108_v36 = vmul.f32 2.0, %v48_v29 }
  0x89   :  { %v75_v40 = vsel %vm73_vm2, %v72_v34, %v71_v31  ;;  %v84_v41 = vrot.slane %v54_v33, 7  ;;  %v102_v42 = vrot.slane %v54_v33, 1  ;;  %v74_v43 = vsel %vm73_vm2, %v71_v31, %v72_v34 }
  0x8a   :  { %v81_v45 = vsel %vm67_vm3, %v80_v28, %v75_v40  ;;  %v94_v46 = vsel %vm92_vm4, %v91_v35, %v90_v38  ;;  %v110_v47 = vadd.f32 %v108_v36, %v74_v43  ;;  %v93_v56 = vsel %vm92_vm4, %v90_v38, %v91_v35 }
  0x8b   :  { %v85_v48 = vsel %vm73_vm2, %v83_v37, %v84_v41  ;;  %v86_v49 = vsel %vm73_vm2, %v84_v41, %v83_v37  ;;  %v100_v50 = vsel %vm70_vm5, %v80_v28, %v94_v46  ;;  %v103_v51 = vsel %vm92_vm4, %v101_v39, %v102_v42 }
  0x8c   :  { %v88_v52 = vsel %vm67_vm3, %v87_v32, %v86_v49  ;;  %v104_v53 = vsel %vm92_vm4, %v102_v42, %v101_v39  ;;  %v109_v54 = vadd.f32 %v107_v44, %v81_v45  ;;  %v112_v55 = vadd.f32 %v110_v47, %v100_v50 }
  0x8d   :  { %v106_v57 = vsel %vm70_vm5, %v87_v32, %v104_v53  ;;  %v113_v58 = vsub.f32 %v103_v51, %v88_v52 }
  0x8e   :  { %v111_v59 = vadd.f32 %v109_v54, %v93_v56  ;;  %v114_v60 = vsub.f32 %v106_v57, %v85_v48  ;;  %v116_v61 = vmul.f32 %v112_v55, %v112_v55 }
  0x8f   :  { %v117_v62 = vmul.f32 %v113_v58, %v113_v58 }
  0x90   :  { %v115_v63 = vmul.f32 %v111_v59, %v111_v59  ;;  %v118_v0 = vmul.f32 %v114_v60, %v114_v60 }
  0x92   :  { %v119_v1 = vadd.f32 %v117_v62, %v115_v63  ;;  %v120_v2 = vadd.f32 %v118_v0, %v116_v61 }
  0x94   :  { %v126_v3 = vsel %vm123_vm6, %v119_v1, 0.0  ;;  %v127_v4 = vsel %vm123_vm6, %v120_v2, 0.0 }
  0x95   :  { %v128_v6 = vmax.f32 %v126_v3, %v127_v4 }
  0x97   :  { %129 = vmax.xlane.f32.xlu0 %v128_v6 }
 0x10a   :  { %v130_v7 = vpop.xlane.xlu0 %129 }
 0x10b   :  { %v131_v8 = vrot.slane %v130_v7, 4 }
 0x10d   :  { %v132_v9 = vmax.f32 %v130_v7, %v131_v8 }
 0x10f   :  { %v133_v10 = vrot.slane %v132_v9, 2 }
 0x111   :  { %v134_v11 = vmax.f32 %v132_v9, %v133_v10 }
 0x113   :  { %v135_v12 = vrot.slane %v134_v11, 1 }
 0x115   :  { %v136_v13 = vmax.f32 %v134_v11, %v135_v12 }
 0x117   :  { %212 = vpush %v136_v13 }
 0x148   :  { %s213_s0 = spop %212 }
 0x149   :  { %v138_v14 = vstv %s213_s0 }
 0x14a   :  { %223 = vrcp.f32 %v138_v14  ;;  %v150_v17 = vand.u32 2147483648, %v138_v14  ;;  %v148_v19 = vand.u32 2147483647, %v138_v14  ;;  %vm144_vm8 = vweird.f32 %v138_v14 }
 0x14c   :  { %v151_v21 = vor.u32 1.1754944e-38, %v150_v17  ;;  %vm149_vm10 = vcmp.eq.f32.partialorder %v148_v19, 8.507059e+37 }
 0x150   :  { %v224_v15 = vpop.eup %223 }
 0x151   :  { %v140_v16 = vmul.f32 %v224_v15, %v138_v14  ;;  %vm145_vm7 = vweird.f32 %v224_v15 }
 0x152   :  { %vm146_vm9 = vmor %vm144_vm8, %vm145_vm7 }
 0x153   :  { %v141_v5 = vsub.f32 1.0, %v140_v16 }
 0x155   :  { %v142_v18 = vmul.f32 %v224_v15, %v141_v5 }
 0x157   :  { %v143_v20 = vadd.f32 %v224_v15, %v142_v18 }
 0x159   :  { %v147_v22 = vsel %vm146_vm9, %v224_v15, %v143_v20 }
 0x15a   :  { %v152_v23 = vsel %vm149_vm10, %v151_v21, %v147_v22 }
 0x15b   :  { %214 = vpush %v152_v23 }
 0x18c   :  { %s215_s15 = spop %214 }
 0x18d   :  { %v154_v24 = vstv %s215_s15 }
 0x18e   :  { %v155_v25 = vmul.f32 %v154_v24, %v119_v1  ;;  %v156_v26 = vmul.f32 %v154_v24, %v120_v2 }
 0x190   :  { %225 = vrsqrt.f32 %v155_v25  ;;  %vm164_vm11 = vcmp.eq.f32.partialorder %v155_v25, inf  ;;  %v167_v40 = vand.u32 2147483648, %v155_v25  ;;  %vm166_vm12 = vcmp.eq.f32.partialorder %v155_v25, 0.0 }
 0x191   :  { %227 = vrsqrt.f32 %v156_v26  ;;  %vm176_vm13 = vcmp.eq.f32.partialorder %v156_v26, inf  ;;  %v179_v43 = vand.u32 2147483648, %v156_v26  ;;  %vm178_vm14 = vcmp.eq.f32.partialorder %v156_v26, 0.0 }
 0x196   :  { %v226_v27 = vpop.eup %225 }
 0x197   :  { %v228_v28 = vpop.eup %227  ;;  %v158_v29 = vmul.f32 %v226_v27, %v155_v25 }
 0x198   :  { %v170_v30 = vmul.f32 %v228_v28, %v156_v26 }
 0x199   :  { %v159_v31 = vmul.f32 %v226_v27, %v158_v29 }
 0x19a   :  { %v171_v32 = vmul.f32 %v228_v28, %v170_v30 }
 0x19b   :  { %v160_v33 = vmul.f32 0.5, %v159_v31 }
 0x19c   :  { %v172_v34 = vmul.f32 0.5, %v171_v32 }
 0x19d   :  { %v161_v35 = vsub.f32 1.5, %v160_v33 }
 0x19e   :  { %v173_v36 = vsub.f32 1.5, %v172_v34 }
 0x19f   :  { %v162_v37 = vmul.f32 %v226_v27, %v161_v35 }
 0x1a0   :  { %v174_v38 = vmul.f32 %v228_v28, %v173_v36 }
 0x1a1   :  { %v163_v39 = vmul.f32 %v162_v37, %v155_v25 }
 0x1a2   :  { %v175_v41 = vmul.f32 %v174_v38, %v156_v26 }
 0x1a3   :  { %v165_v42 = vsel %vm164_vm11, %v155_v25, %v163_v39 }
 0x1a4   :  { %v168_v44 = vsel %vm166_vm12, %v167_v40, %v165_v42  ;;  %v177_v45 = vsel %vm176_vm13, %v156_v26, %v175_v41 }
 0x1a5   :  { %v180_v46 = vsel %vm178_vm14, %v179_v43, %v177_v45  ;;  %vm181_vm15 = vcmp.ge.f32.partialorder %v168_v44, 0.6 }
 0x1a6   :  { %vm182_vm0 = vcmp.ge.f32.partialorder %v180_v46, 0.6  ;;  %v183_v47 = vsel %vm181_vm15, 1.0, %v168_v44 }
 0x1a7   :  { %v184_v48 = vsel %vm182_vm0, 1.0, %v180_v46  ;;  %vm185_vm1 = vcmp.le.f32.partialorder %v183_v47, 0.1 }
 0x1a8   :  { %vm186_vm2 = vcmp.le.f32.partialorder %v184_v48, 0.1  ;;  %v187_v49 = vsel %vm185_vm1, 0.0, %v183_v47 }
 0x1a9   :  { %v188_v50 = vsel %vm186_vm2, 0.0, %v184_v48  ;;  %189 = vst [vmem:[#allocation5] sm:$0xff] %v187_v49 }
 0x1aa   :  { %190 = vst [vmem:[#allocation5 + $0x8] sm:$0xff] %v188_v50 }
 0x1ab   :  { %203 = dma.vmem_to_hbm [thread:$0]  %s196_s17, 256, %s198_s20, [#allocation4], %s282_s11, %s282_s11, %s283_s12  }
 0x1ac   :  { %279 = dma.done.wait [#allocation4], 256  }
 0x1ad   :  { %280 = vsyncadd [#allocation4], 4294967040 }
 0x1ae   :  { %208 = vsyncpa [#allocation3], 1 }
 0x1af   :  { %209 = vsyncpa [#allocation4], 1 }

</bundles_post_ra>
